<compile_context>
chip_gen: v7x
topology: tpu7x:2x2x1
jax: 0.10.0
libtpu: 0.0.40
codegen_flags: <defaults>
</compile_context>

<pallas_src>
import jax
import jax.numpy as jnp
from jax import lax
from jax.experimental import pallas as pl
from jax.experimental.pallas import tpu as pltpu

# ---------------- synthetic config (small) ----------------
NUM_USERS = 8
NUM_ITEMS = 8
NUM_NODES = NUM_USERS + NUM_ITEMS      # in_c of RGCLayer
NUM_RELATIONS = 3
HIDDEN0 = 32                           # config.hidden_size[0]
HIDDEN1 = 16                           # config.hidden_size[1] == BiDecoder feature_dim
NUM_BASIS = 2
NUM_EDGES = 40
# accum == 'sum'; rgc_relu = dense_relu = True; bidec_drop = False


# ================= fused GAE forward kernel =================
def gae_kernel(adj_ref, wcum_ref, wdense_ref, qcat_ref, o_ref):
    # Stage 1: RGC layer — single K = R*N contraction, ReLU fused in.
    feats = jnp.maximum(
        jnp.dot(adj_ref[...], wcum_ref[...],
                preferred_element_type=jnp.float32),
        0.0)                                               # (N, H0)

    # Stage 2: shared dense layer applied once to all nodes, then split.
    dense = jnp.maximum(
        jnp.dot(feats, wdense_ref[...],
                preferred_element_type=jnp.float32),
        0.0)                                               # (N, H1)
    u_feats = dense[:NUM_USERS]                            # (Nu, H1)
    i_feats = dense[NUM_USERS:]                            # (Ni, H1)

    # Stage 3: BiDecoder.
    # One lane-dense matmul computes U @ Q_r for all relations at once:
    #   t_cat[u, r*H1 + k] = (U @ Q_r)[u, k]
    t_cat = jnp.dot(u_feats, qcat_ref[...],
                    preferred_element_type=jnp.float32)    # (Nu, R*H1)

    outs = []
    for r in range(NUM_RELATIONS):                         # static unroll, R=3
        t_r = t_cat[:, r * HIDDEN1:(r + 1) * HIDDEN1]      # static lane slice
        # contract the last axes of t_r and I (== t_r @ I^T) without an
        # explicit transpose, so the MXU consumes I in its stored layout.
        outs.append(lax.dot_general(
            t_r, i_feats,
            dimension_numbers=(((1,), (1,)), ((), ())),
            preferred_element_type=jnp.float32))           # (Nu, Ni)

    # single lane-dense store: slab[u, r*Ni + i] = score(u, i, r)
    o_ref[...] = jnp.concatenate(outs, axis=-1).astype(o_ref.dtype)


def gae_pallas(adj_cat, w_cum_cat, w_dense, q_cat):
    # Gridless pallas_call: whole operands are a few KB each, so they are
    # mapped as full-array VMEM blocks (no pipelining, no double buffering).
    vmem = pl.BlockSpec(memory_space=pltpu.MemorySpace.VMEM)
    return pl.pallas_call(
        gae_kernel,
        out_shape=jax.ShapeDtypeStruct(
            (NUM_USERS, NUM_RELATIONS * NUM_ITEMS), jnp.float32),
        in_specs=[vmem, vmem, vmem, vmem],
        out_specs=vmem,
    )(adj_cat, w_cum_cat, w_dense, q_cat)


# ================= Full GAE forward (JAX glue + fused kernel) =================
def gae_forward(x, edge_index, edge_type, edge_norm, params):
    # x is the node-id feature vector (arange(num_nodes)) as in GCMC; the
    # dense A_r @ W_r formulation already encodes the x_j gather.
    del x
    # dense relational adjacency built DIRECTLY in the collapsed layout:
    #   adj_cat[t, r*N + s] += edge_norm   for edge (s -> t) of relation r
    adj_cat = jnp.zeros((NUM_NODES, NUM_RELATIONS * NUM_NODES), jnp.float32)
    adj_cat = adj_cat.at[edge_index[1],
                         edge_type * NUM_NODES + edge_index[0]].add(edge_norm)

    # ordinal cumulative relation weights, concatenated along the same axis:
    #   W_cat[r*N + s, h] = (cumsum_r ord_basis)[r, s, h]
    w_cum_cat = jnp.cumsum(params["ord_basis"], axis=0).reshape(
        NUM_RELATIONS * NUM_NODES, HIDDEN0)

    # Q_r = sum_b coef[r, b] * basis[b], lane-concatenated:
    #   q_cat[j, r*H1 + k] = Q_r[j, k]
    q_all = jnp.einsum("rb,bjk->rjk", params["coefs"], params["basis"])
    q_cat = jnp.transpose(q_all, (1, 0, 2)).reshape(
        HIDDEN1, NUM_RELATIONS * HIDDEN1)

    out_slab = gae_pallas(adj_cat, w_cum_cat, params["w_dense"], q_cat)
    # (Nu, R*Ni) -> (Nu, Ni, R) -> (Nu*Ni, R)   [matches torch cat(dim=2)+reshape]
    out = out_slab.reshape(NUM_USERS, NUM_RELATIONS, NUM_ITEMS)
    return jnp.transpose(out, (0, 2, 1)).reshape(
        NUM_USERS * NUM_ITEMS, NUM_RELATIONS)


# ================= pure-JAX reference for sanity =================
def gae_reference(x, edge_index, edge_type, edge_norm, params):
    del x
    adj = jnp.zeros((NUM_RELATIONS, NUM_NODES, NUM_NODES), jnp.float32)
    adj = adj.at[edge_type, edge_index[1], edge_index[0]].add(edge_norm)
    w_cum = jnp.cumsum(params["ord_basis"], axis=0).reshape(
        NUM_RELATIONS, NUM_NODES, HIDDEN0)
    feats = jax.nn.relu(jnp.einsum("rts,rsh->th", adj, w_cum))
    u = jax.nn.relu(feats[:NUM_USERS] @ params["w_dense"])
    i = jax.nn.relu(feats[NUM_USERS:] @ params["w_dense"])
    outs = []
    for r in range(NUM_RELATIONS):
        q = jnp.einsum("b,bij->ij", params["coefs"][r], params["basis"])
        outs.append(u @ q @ i.T)
    out = jnp.stack(outs, axis=-1)
    return out.reshape(NUM_USERS * NUM_ITEMS, NUM_RELATIONS)


if __name__ == "__main__":
    key = jax.random.PRNGKey(0)
    k_ob, k_wd, k_bas, k_cf, k_src, k_dst, k_et, k_en = jax.random.split(key, 8)

    # ----- deterministic parameters -----
    ord_basis = 0.1 * jax.random.normal(
        k_ob, (NUM_RELATIONS, NUM_NODES * HIDDEN0), jnp.float32)
    w_dense = jax.random.normal(
        k_wd, (HIDDEN0, HIDDEN1), jnp.float32) / jnp.sqrt(float(HIDDEN0))
    # orthogonal rows for basis_matrix (num_basis, D*D), as nn.init.orthogonal_
    g = jax.random.normal(k_bas, (HIDDEN1 * HIDDEN1, NUM_BASIS), jnp.float32)
    q_ortho, _ = jnp.linalg.qr(g)
    basis = q_ortho.T.reshape(NUM_BASIS, HIDDEN1, HIDDEN1).astype(jnp.float32)
    coefs = 0.5 * jax.random.normal(
        k_cf, (NUM_RELATIONS, NUM_BASIS), jnp.float32)
    params = {"ord_basis": ord_basis, "w_dense": w_dense,
              "basis": basis, "coefs": coefs}

    # ----- deterministic graph inputs -----
    x = jnp.arange(NUM_NODES, dtype=jnp.int32)
    src = jax.random.randint(k_src, (NUM_EDGES,), 0, NUM_USERS)          # users
    dst = jax.random.randint(k_dst, (NUM_EDGES,), NUM_USERS, NUM_NODES)  # items
    edge_index = jnp.stack([jnp.concatenate([src, dst]),
                            jnp.concatenate([dst, src])], axis=0)        # (2, 2E)
    et = jax.random.randint(k_et, (NUM_EDGES,), 0, NUM_RELATIONS)
    edge_type = jnp.concatenate([et, et])
    en = jax.random.uniform(k_en, (NUM_EDGES,), jnp.float32, 0.1, 1.0)
    edge_norm = jnp.concatenate([en, en])

    out = jax.jit(gae_forward)(x, edge_index, edge_type, edge_norm, params)
    out = jax.block_until_ready(out)

    ref = gae_reference(x, edge_index, edge_type, edge_norm, params)
    assert out.shape == (NUM_USERS * NUM_ITEMS, NUM_RELATIONS), out.shape
    assert jnp.allclose(out, ref, rtol=1e-3, atol=1e-3), "mismatch vs reference"

    print("KERNEL_OK")
</pallas_src>

<mosaic_0001>
module attributes {stable_mosaic.version = 11 : i64} {
  func.func private @main(%arg0: i32) attributes {dimension_semantics = [#tpu.dimension_semantics<core_parallel>], iteration_bounds = array<i64: 2>, tpu.core_type = #tpu.core_type<sc_scalar_subcore>, window_params = []} {
    return
  }
}

module attributes {stable_mosaic.version = 11 : i64} {
  func.func private @main(%arg0: i32) attributes {dimension_semantics = [#tpu.dimension_semantics<core_parallel>], iteration_bounds = array<i64: 2>, tpu.core_type = #tpu.core_type<sc_scalar_subcore>, window_params = []} {
    return
  }
}

module attributes {stable_mosaic.version = 11 : i64} {
  func.func @gae_kernel(%arg0: memref<16x48xf32, #tpu.memory_space<vmem>>, %arg1: memref<48x32xf32, #tpu.memory_space<vmem>>, %arg2: memref<32x16xf32, #tpu.memory_space<vmem>>, %arg3: memref<16x48xf32, #tpu.memory_space<vmem>>, %arg4: memref<8x24xf32, #tpu.memory_space<vmem>>) attributes {dimension_semantics = [], scalar_prefetch = 0 : i64, scratch_operands = 0 : i64, tpu.core_type = #tpu.core_type<tc>} {
    %c0 = arith.constant 0 : index
    %c0_0 = arith.constant 0 : index
    %0 = vector.load %arg0[%c0, %c0_0] : memref<16x48xf32, #tpu.memory_space<vmem>>, vector<16x48xf32>
    %c0_1 = arith.constant 0 : index
    %c0_2 = arith.constant 0 : index
    %1 = vector.load %arg1[%c0_1, %c0_2] : memref<48x32xf32, #tpu.memory_space<vmem>>, vector<48x32xf32>
    %cst = arith.constant dense<0.000000e+00> : vector<16x32xf32>
    %2 = tpu.matmul %0, %1, %cst {dimension_numbers = #tpu.dot_dimension_numbers<[1], [0], [0], [1], [0, 0, 1, 1], [], []>} : vector<16x48xf32>, vector<48x32xf32>, vector<16x32xf32> -> vector<16x32xf32>
    %cst_3 = arith.constant 0.000000e+00 : f32
    %3 = vector.broadcast %cst_3 : f32 to vector<16x32xf32>
    %4 = arith.maximumf %2, %3 : vector<16x32xf32>
    %c0_4 = arith.constant 0 : index
    %c0_5 = arith.constant 0 : index
    %5 = vector.load %arg2[%c0_4, %c0_5] : memref<32x16xf32, #tpu.memory_space<vmem>>, vector<32x16xf32>
    %cst_6 = arith.constant dense<0.000000e+00> : vector<16x16xf32>
    %6 = tpu.matmul %4, %5, %cst_6 {dimension_numbers = #tpu.dot_dimension_numbers<[1], [0], [0], [1], [0, 0, 1, 1], [], []>} : vector<16x32xf32>, vector<32x16xf32>, vector<16x16xf32> -> vector<16x16xf32>
    %cst_7 = arith.constant 0.000000e+00 : f32
    %7 = vector.broadcast %cst_7 : f32 to vector<16x16xf32>
    %8 = arith.maximumf %6, %7 : vector<16x16xf32>
    %9 = vector.extract_strided_slice %8 {offsets = [0, 0], sizes = [8, 16], strides = [1, 1]} : vector<16x16xf32> to vector<8x16xf32>
    %10 = vector.extract_strided_slice %8 {offsets = [8, 0], sizes = [8, 16], strides = [1, 1]} : vector<16x16xf32> to vector<8x16xf32>
    %c0_8 = arith.constant 0 : index
    %c0_9 = arith.constant 0 : index
    %11 = vector.load %arg3[%c0_8, %c0_9] : memref<16x48xf32, #tpu.memory_space<vmem>>, vector<16x48xf32>
    %cst_10 = arith.constant dense<0.000000e+00> : vector<8x48xf32>
    %12 = tpu.matmul %9, %11, %cst_10 {dimension_numbers = #tpu.dot_dimension_numbers<[1], [0], [0], [1], [0, 0, 1, 1], [], []>} : vector<8x16xf32>, vector<16x48xf32>, vector<8x48xf32> -> vector<8x48xf32>
    %13 = vector.extract_strided_slice %12 {offsets = [0, 0], sizes = [8, 16], strides = [1, 1]} : vector<8x48xf32> to vector<8x16xf32>
    %cst_11 = arith.constant dense<0.000000e+00> : vector<8x8xf32>
    %14 = tpu.matmul %13, %10, %cst_11 {dimension_numbers = #tpu.dot_dimension_numbers<[1], [1], [0], [0], [0, 0, 1, 0], [], []>} : vector<8x16xf32>, vector<8x16xf32>, vector<8x8xf32> -> vector<8x8xf32>
    %15 = vector.extract_strided_slice %12 {offsets = [0, 16], sizes = [8, 16], strides = [1, 1]} : vector<8x48xf32> to vector<8x16xf32>
    %cst_12 = arith.constant dense<0.000000e+00> : vector<8x8xf32>
    %16 = tpu.matmul %15, %10, %cst_12 {dimension_numbers = #tpu.dot_dimension_numbers<[1], [1], [0], [0], [0, 0, 1, 0], [], []>} : vector<8x16xf32>, vector<8x16xf32>, vector<8x8xf32> -> vector<8x8xf32>
    %17 = vector.extract_strided_slice %12 {offsets = [0, 32], sizes = [8, 16], strides = [1, 1]} : vector<8x48xf32> to vector<8x16xf32>
    %cst_13 = arith.constant dense<0.000000e+00> : vector<8x8xf32>
    %18 = tpu.matmul %17, %10, %cst_13 {dimension_numbers = #tpu.dot_dimension_numbers<[1], [1], [0], [0], [0, 0, 1, 0], [], []>} : vector<8x16xf32>, vector<8x16xf32>, vector<8x8xf32> -> vector<8x8xf32>
    %19 = tpu.concatenate %14, %16, %18 in 1 : vector<8x8xf32>, vector<8x8xf32>, vector<8x8xf32> -> vector<8x24xf32>
    %c0_14 = arith.constant 0 : index
    %c0_15 = arith.constant 0 : index
    %20 = vector.load %arg4[%c0_14, %c0_15] : memref<8x24xf32, #tpu.memory_space<vmem>>, vector<8x24xf32>
    tpu.vector_store %arg4[%c0_14, %c0_15], %19 {strides = array<i32>} : memref<8x24xf32, #tpu.memory_space<vmem>>, vector<8x24xf32>,
    return
  }
}

</mosaic_0001>

<bundles_post_ra>
// kernel: gae_forward.1
= control target key start
LH: loop header
LB: loop body
LE: loop exit
PB: predicated region body
PF: predicated region fallthrough
CT: control target
= control target key end

     0   :  { %9 = vsyncpa [#allocation3], 0  ;;  %s667_s15 = smov [#allocation2]   ;;  %s768_s0 = inlined_call_operand.hbm [shape: f32[16,48], index: 0, kind: input, shape index: {}]   ;;  %s769_s1 = inlined_call_operand.vmem [shape: f32[48,32], index: 1, kind: input, shape index: {}]   ;;  %s770_s2 = inlined_call_operand.vmem [shape: f32[32,16], index: 2, kind: input, shape index: {}]   ;;  %s771_s3 = inlined_call_operand.vmem [shape: f32[16,48], index: 3, kind: input, shape index: {}]   ;;  %s772_s4 = inlined_call_operand.vmem [shape: f32[8,24], index: 4, kind: output, shape index: {}]  }
   0x1   :  { %s15_s16 = sshll.u32 %s667_s15, 4  ;;  %s643_s19 = scalar_lea.hbm %s768_s0, 256  ;;  %s16_s16 = int_to_ptr.vmem [resolvable:$true] %s15_s16 }
   0x2   :  { %p644_p0 = scmp.ne.s32.totalorder %s768_s0, %s643_s19  ;;  %p647_p1 = scmp.lt.u32.totalorder %s643_s19, %s768_s0 }
   0x4   :  { %p649_p2 = pnand %p647_p1, %p644_p0 }
   0x6   :  { %652 = shalt.err (!%p649_p2)
}
   0x7   :  { %s653_s24 = scalar_lea.vmem %s16_s16, 256  ;;  %p658_p4 = scmp.lt.s32.totalorder %s16_s16, %s16_s16 }
   0x8   :  { %p654_p3 = scmp.ne.s32.totalorder %s16_s16, %s653_s24  ;;  %p659_p5 = scmp.lt.s32.totalorder %s653_s24, %s653_s24 }
   0xa   :  { %p660_p6 = por %p659_p5, %p658_p4 }
   0xc   :  { %p661_p7 = pnand %p660_p6, %p654_p3 }
   0xe   :  { %664 = shalt.err (!%p661_p7)
}
   0xf   :  { %s668_s25 = smov 128   ;;  %s669_s26 = smov 8  }
  0x10   :  { %21 = dma.hbm_to_vmem [thread:$0]  %s768_s0, 256, %s16_s16, [#allocation3], %s668_s25, %s668_s25, %s669_s26  }
  0x11   :  { %665 = dma.done.wait [#allocation3], 256  }
  0x12   :  { %666 = vsyncadd [#allocation3], 4294967040  ;;  %v33_v0 = vld [vmem:[%s769_s1] sm:$0xff]  ;;  %v34_v1 = vld [vmem:[%s769_s1 + $0x8] sm:$0xff]  ;;  %vm39_vm0 = vcmask 392192   ;;  %v670_v17 = vmov 0.0|0.0  }
  0x13   :  { %v35_v2 = vld [vmem:[%s769_s1 + $0x10] sm:$0xff]  ;;  %v611_v3 = vpack.c.bf16 %v34_v1, %v33_v0  ;;  %v36_v4 = vld [vmem:[%s769_s1 + $0x18] sm:$0xff]  ;;  %v37_v5 = vld [vmem:[%s769_s1 + $0x20] sm:$0xff]  ;;  %vm127_vm1 = vcmask 261120   ;;  %v671_v25 = vmov 0.0   ;;  %vm672_vm2 = vmmov 0  }
  0x14   :  { %v615_v6 = vpack.c.bf16 %v36_v4, %v35_v2  ;;  %v38_v7 = vld [vmem:[%s769_s1 + $0x28] sm:$0xff]  ;;  %v31_v8 = vld [vmem:[#allocation2] sm:$0xff]  ;;  %v125_v14 = vld [vmem:[%s770_s2 + $0x10] sm:$0xff]  ;;  %vm213_vm3 = vcmask 130048   ;;  %s675_s25 = smov 16   ;;  %vm519_vm4 = vcmask 64512  }
  0x15   :  { %v123_v9 = vld [vmem:[%s770_s2] sm:$0xff]  ;;  %612 = vmatprep.subr.bf16.mxu0 %v611_v3  ;;  %575 = vmatprep.mubr.msk.f32.mxu0 %vm39_vm0, %v31_v8  ;;  %v124_v10 = vld [vmem:[%s770_s2 + $0x8] sm:$0xff]  ;;  %v619_v12 = vpack.c.bf16 %v38_v7, %v37_v5  ;;  %v126_v15 = vld [vmem:[%s770_s2 + $0x18] sm:$0xff]  ;;  %s673_s2 = smov 112   ;;  %vm522_vm5 = vcmask 195584  }
  0x16   :  { %614 = vmatpush3.bf16.msra.mxu0 %v611_v3  ;;  %v623_v11 = vpack.c.bf16 %v124_v10, %v123_v9  ;;  %v32_v13 = vld [vmem:[#allocation2 + $0x8] sm:$0xff]  ;;  %v627_v16 = vpack.c.bf16 %v126_v15, %v125_v14  ;;  %v211_v18 = vld [vmem:[%s771_s3] sm:$0xff] }
  0x17   :  { %616 = vmatprep.subr.bf16.mxu0 %v615_v6  ;;  %v212_v19 = vld [vmem:[%s771_s3 + $0x8] sm:$0xff]  ;;  %s674_s3 = smov 96  }
  0x18   :  { %624 = vmatprep.subr.bf16.mxu1 %v623_v11  ;;  %v632_v23 = vpack.c.bf16 %v212_v19, %v211_v18 }
  0x19   :  { %626 = vmatpush3.bf16.msra.mxu1 %v623_v11 }
  0x1a   :  { %618 = vmatpush3.bf16.msra.mxu0 %v615_v6  ;;  %628 = vmatprep.subr.bf16.mxu1 %v627_v16 }
  0x1b   :  { %620 = vmatprep.subr.bf16.mxu0 %v619_v12 }
  0x1d   :  { %630 = vmatpush3.bf16.msra.mxu1 %v627_v16 }
  0x1e   :  { %622 = vmatpush3.bf16.msra.mxu0 %v619_v12  ;;  %631 = vmatprep.subr.bf16.mxu1 %v670_v17 }
  0x1f   :  { %596 = vmatprep.subr.mxu0 %v671_v25 }
  0x21   :  { %576 = vmatmul.mubr.msk.f32.vlgmr.msra.gmra.mrb[0].mxu0 %vm39_vm0, %v32_v13 }
  0x22   :  { %598 = vmatprep.mubr.msk.f32.mxu0 %vm672_vm2, %v671_v25 }
  0xf4   :  { %v577_v20 = vpop.f32.mrb[0].mxu0 }
  0xf5   :  { %v112_v21 = vpop.f32.mrb[1].mxu0  ;;  %v122_v24 = vmax.f32 %v577_v20, 0.0 }
  0xf6   :  { %v121_v22 = vmax.f32 %v112_v21, 0.0 }
  0xf8   :  { %586 = vmatprep.mubr.msk.f32.mxu1 %vm127_vm1, %v121_v22 }
  0xf9   :  { %587 = vmatmul.mubr.msk.f32.vlgmr.msra.gmra.mrb[0].mxu1 %vm127_vm1, %v122_v24 }
  0xfa   :  { %633 = vmatpush3.bf16.msra.mxu1 %v632_v23  ;;  %593 = vmatprep.mubr.msk.f32.mxu1 %vm672_vm2, %v671_v25 }
  0xfb   :  { %601 = vmatprep.subr.mxu1 %v671_v25 }
 0x1cc   :  { %v588_v26 = vpop.f32.mrb[0].mxu1 }
 0x1cd   :  { %v210_v27 = vmax.f32 %v588_v26, 0.0  ;;  %v200_v28 = vpop.f32.mrb[1].mxu1 }
 0x1ce   :  { %v209_v29 = vmax.f32 %v200_v28, 0.0 }
 0x1cf   :  { %597 = vmatpush3.xpose.msk.msra.mxu0 %vm213_vm3, %v210_v27 }
 0x1d0   :  { %594 = vmatmul.mubr.msk.f32.vlgmr.msra.gmra.mrb[2].mxu1 %vm213_vm3, %v209_v29  ;;  %606 = vmatprep.subr.mxu0 %v671_v25 }
 0x1d1   :  { %602 = vmatpush3.xpose.msk.msra.mxu1 %vm213_vm3, %v210_v27  ;;  %603 = vmatprep.mubr.msk.f32.mxu1 %vm672_vm2, %v671_v25 }
 0x2a3   :  { %v283_v30 = vpop.f32.mrb[2].mxu1 }
 0x2a4   :  { %363 = vrot.lane.b32.xlu0 %v283_v30, %s673_s2  ;;  %v595_v31 = vpop.f32.mrb[3].mxu1  ;;  %599 = vmatmul.mubr.msk.f32.vlgmr.msra.gmra.mrb[2].mxu0 %vm213_vm3, %v283_v30 }
 0x2a5   :  { %607 = vmatpush3.xpose.msk.msra.mxu0 %vm213_vm3, %v210_v27  ;;  %608 = vmatprep.mubr.msk.f32.mxu0 %vm672_vm2, %v671_v25 }
 0x2a8   :  { %437 = vrot.lane.b32.xlu0 %v283_v30, %s674_s3 }
 0x316   :  { %v364_v32 = vpop.permute.xlu0 %363 }
 0x317   :  { %604 = vmatmul.mubr.msk.f32.vlgmr.msra.gmra.mrb[4].mxu1 %vm213_vm3, %v364_v32 }
 0x31a   :  { %v438_v33 = vpop.permute.xlu0 %437 }
 0x31b   :  { %609 = vmatmul.mubr.msk.f32.vlgmr.msra.gmra.mrb[4].mxu0 %vm213_vm3, %v438_v33 }
 0x377   :  { %v359_v34 = vpop.f32.mrb[2].mxu0 }
 0x378   :  { %v600_v35 = vpop.f32.mrb[3].mxu0 }
 0x3ea   :  { %v433_v36 = vpop.f32.mrb[4].mxu1 }
 0x3eb   :  { %512 = vrot.lane.b32.xlu1 %v433_v36, %s669_s26  ;;  %v605_v37 = vpop.f32.mrb[5].mxu1 }
 0x3ee   :  { %v507_v38 = vpop.f32.mrb[4].mxu0 }
 0x3ef   :  { %v610_v39 = vpop.f32.mrb[5].mxu0  ;;  %516 = vrot.lane.b32.xlu1 %v507_v38, %s675_s25 }
 0x45d   :  { %v513_v40 = vpop.permute.xlu1 %512 }
 0x45e   :  { %v520_v41 = vsel %vm519_vm4, %v359_v34, %v513_v40 }
 0x461   :  { %v517_v42 = vpop.permute.xlu1 %516 }
 0x462   :  { %v521_v43 = vsel %vm213_vm3, %v520_v41, %v517_v42 }
 0x463   :  { %523 = vst.msk [vmem:[%s772_s4] sm:$0xff] %vm522_vm5, %v521_v43 }
 0x464   :  { %528 = vsyncpa [#allocation3], 1 }

</bundles_post_ra>
